<compile_context>
chip_gen: v7x
topology: tpu7x:2x2x1
jax: 0.10.0
libtpu: 0.0.40
codegen_flags: <defaults>
</compile_context>

<pallas_src>
import math

import jax
import jax.numpy as jnp
from jax import lax
from jax.experimental import pallas as pl
from jax.experimental.pallas import tpu as pltpu

INPUT_DIM = 28 * 28                                    # 784, fixed by the module's .view(-1, 28*28)
LANE_PADDED_DIM = ((INPUT_DIM + 127) // 128) * 128     # 896: actual VMEM lane footprint of a row
TILE_N = 4096                                          # rows per grid step (f32: ~14.7 MB/buffer)
MIN_GRID_STEPS = 8                                     # keep both v7x TensorCores fed


def _lr_no_bias_kernel(x_ref, w_ref, o_ref):
    # x_ref: (tile_n, 784) native dtype, w_ref: (1, 784) f32, o_ref: (1, tile_n) f32
    x = x_ref[...].astype(jnp.float32)    # torch's .float(), done in-VMEM
    w = w_ref[...]                        # (1, 784), lane-dense, VMEM-resident
    # w @ x.T: (1, 784) . (tile_n, 784) contracting last dims -> (1, tile_n).
    # Lane-dense result => unmasked vst + contiguous output DMA.  A @ B.T is the
    # natively supported MXU form (same shape pattern as flash-attn's q @ k.T),
    # so no materialized XLU transpose of the full x tile is expected.
    o_ref[...] = lax.dot_general(
        w, x,
        dimension_numbers=(((1,), (1,)), ((), ())),
        preferred_element_type=jnp.float32,
    )


def _choose_tile(n, tile_n, min_steps=MIN_GRID_STEPS):
    """Batch tile: as big as possible for DMA amortization, but >= ~min_steps grid steps."""
    if n <= tile_n:
        return n                                   # single step; block == full array dims
    tn = max(128, (tile_n // 128) * 128)           # lane-aligned (output) / sublane-aligned (input)
    target = ((pl.cdiv(n, min_steps) + 127) // 128) * 128
    return max(128, min(tn, target))


def lr_no_bias_forward(x, weight, *, tile_n=TILE_N):
    """Forward of LR_no_bias: x.float().view(-1, 784) @ weight.T (no bias).

    Args:
      x: any shape whose total size is a multiple of 784 (e.g. (N, 1, 28, 28)),
         any numeric dtype (the .float() cast happens inside the kernel).
      weight: (1, 784), matching nn.Linear(784, 1, bias=False).weight.

    Returns:
      (N, 1) float32.
    """
    x2d = jnp.reshape(x, (-1, INPUT_DIM))        # glue: view(-1, 784), native dtype
    w = weight.astype(jnp.float32)               # (1, 784), tiny; keep lane-dense
    n = x2d.shape[0]

    tn = _choose_tile(n, tile_n)
    num_tiles = pl.cdiv(n, tn)
    grid = (num_tiles,)

    itemsize = jnp.dtype(x2d.dtype).itemsize

    # Scoped-VMEM budget from the real footprint: x is double-buffered and its
    # 784 lanes pad to 896; the (1, tn) f32 output pads to 8 sublanes.
    x_block_bytes = tn * LANE_PADDED_DIM * itemsize
    out_block_bytes = 8 * tn * 4
    w_bytes = 8 * LANE_PADDED_DIM * 4
    needed = 2 * (x_block_bytes + out_block_bytes) + 2 * w_bytes
    vmem_limit = max(16 << 20, min(int(needed * 1.25) + (4 << 20), 96 << 20))

    cost = pl.CostEstimate(
        flops=2 * n * INPUT_DIM,
        transcendentals=0,
        bytes_accessed=n * INPUT_DIM * itemsize + INPUT_DIM * 4 + n * 4,
    )

    out = pl.pallas_call(
        _lr_no_bias_kernel,
        out_shape=jax.ShapeDtypeStruct((1, num_tiles * tn), jnp.float32),
        grid_spec=pltpu.PrefetchScalarGridSpec(
            num_scalar_prefetch=0,
            grid=grid,
            in_specs=[
                # x: one batch tile per grid step (double-buffered by Pallas).
                pl.BlockSpec((tn, INPUT_DIM), lambda i: (i, 0)),
                # weight: constant block index -> stays resident in VMEM.
                pl.BlockSpec((1, INPUT_DIM), lambda i: (0, 0)),
            ],
            # Lane-dense output tiles laid side by side along the lane axis.
            out_specs=pl.BlockSpec((1, tn), lambda i: (0, i)),
        ),
        compiler_params=pltpu.CompilerParams(
            dimension_semantics=("parallel",),
            vmem_limit_bytes=vmem_limit,
        ),
        cost_estimate=cost,
    )(x2d, w)

    # Drop padding columns of the final partial tile and restore (n, 1).
    return jnp.reshape(out[0, :n], (n, 1))


if __name__ == "__main__":
    key = jax.random.PRNGKey(0)
    kx, kw = jax.random.split(key)

    # Small deterministic inputs: batch=2 "images" of shape (1, 28, 28).
    batch = 2
    x = jax.random.normal(kx, (batch, 1, 28, 28), dtype=jnp.float32)

    # Deterministic weight init mimicking nn.Linear's kaiming-uniform bound.
    bound = 1.0 / math.sqrt(INPUT_DIM)
    weight = jax.random.uniform(
        kw, (1, INPUT_DIM), dtype=jnp.float32, minval=-bound, maxval=bound
    )

    out = lr_no_bias_forward(x, weight)
    out = jax.block_until_ready(out)

    # Sanity-check against plain-JAX reference.
    ref = jnp.reshape(x.astype(jnp.float32), (-1, INPUT_DIM)) @ weight.T
    assert out.shape == (batch, 1)
    assert jnp.allclose(out, ref, atol=1e-5, rtol=1e-5)

    print("KERNEL_OK")
</pallas_src>

<mosaic_0001>
module attributes {stable_mosaic.version = 11 : i64} {
  func.func @_lr_no_bias_kernel(%arg0: i32, %arg1: memref<2x784xf32, #tpu.memory_space<vmem>>, %arg2: memref<1x784xf32, #tpu.memory_space<vmem>>, %arg3: memref<1x2xf32, #tpu.memory_space<vmem>>) attributes {dimension_semantics = [#tpu.dimension_semantics<parallel>], iteration_bounds = array<i64: 1>, scalar_prefetch = 0 : i64, scratch_operands = 0 : i64, tpu.core_type = #tpu.core_type<tc>, window_params = [{transform_indices = @transform_0, window_bounds = array<i64: 2, 784>}, {pipeline_mode = #tpu.pipeline_mode<synchronous>, transform_indices = @transform_1, window_bounds = array<i64: 1, 784>}, {transform_indices = @transform_2, window_bounds = array<i64: 1, 2>}]} {
    %c0 = arith.constant 0 : index
    %c0_0 = arith.constant 0 : index
    %0 = vector.load %arg1[%c0, %c0_0] : memref<2x784xf32, #tpu.memory_space<vmem>>, vector<2x784xf32>
    %c0_1 = arith.constant 0 : index
    %c0_2 = arith.constant 0 : index
    %1 = vector.load %arg2[%c0_1, %c0_2] : memref<1x784xf32, #tpu.memory_space<vmem>>, vector<1x784xf32>
    %cst = arith.constant dense<0.000000e+00> : vector<1x2xf32>
    %2 = tpu.matmul %1, %0, %cst {dimension_numbers = #tpu.dot_dimension_numbers<[1], [1], [0], [0], [0, 0, 1, 0], [], []>} : vector<1x784xf32>, vector<2x784xf32>, vector<1x2xf32> -> vector<1x2xf32>
    %c0_3 = arith.constant 0 : index
    %c0_4 = arith.constant 0 : index
    %3 = vector.load %arg3[%c0_3, %c0_4] : memref<1x2xf32, #tpu.memory_space<vmem>>, vector<1x2xf32>
    tpu.vector_store %arg3[%c0_3, %c0_4], %2 {strides = array<i32>} : memref<1x2xf32, #tpu.memory_space<vmem>>, vector<1x2xf32>,
    return
  }
  func.func @transform_0(%arg0: i32) -> (i32, i32) {
    %c0_i32 = arith.constant 0 : i32
    %c0_i32_0 = arith.constant 0 : i32
    return %arg0, %c0_i32 : i32, i32
  }
  func.func @transform_1(%arg0: i32) -> (i32, i32) {
    %c0_i32 = arith.constant 0 : i32
    %c0_i32_0 = arith.constant 0 : i32
    %c0_i32_1 = arith.constant 0 : i32
    return %c0_i32, %c0_i32_0 : i32, i32
  }
  func.func @transform_2(%arg0: i32) -> (i32, i32) {
    %c0_i32 = arith.constant 0 : i32
    %c0_i32_0 = arith.constant 0 : i32
    return %c0_i32, %arg0 : i32, i32
  }
}

</mosaic_0001>

<bundles_post_ra>
// kernel: tpu_custom_call.1
= control target key start
LH: loop header
LB: loop body
LE: loop exit
PB: predicated region body
PF: predicated region fallthrough
CT: control target
= control target key end

     0   :  { %7 = vsyncpa [#allocation3], 0  ;;  %s569_s0 = inlined_call_operand.hbm [shape: f32[2,784], index: 0, kind: input, shape index: {}]   ;;  %s570_s1 = inlined_call_operand.hbm [shape: f32[1,784], index: 1, kind: input, shape index: {}]   ;;  %s571_s2 = inlined_call_operand.hbm [shape: f32[1,2], index: 2, kind: output, shape index: {}]  }
   0x1   :  { %8 = vsyncpa [#allocation6], 0 }
   0x2   :  { %9 = vsyncpa [#allocation4], 0  ;;  %s512_s9 = smov [#allocation2]   ;;  %s513_s11 = smov [#allocation5]  }
   0x3   :  { %s16_s10 = sshll.u32 %s512_s9, 4  ;;  %s26_s12 = sshll.u32 %s513_s11, 4  ;;  %s17_s10 = int_to_ptr.vmem [resolvable:$true] %s16_s10  ;;  %s27_s12 = int_to_ptr.vmem [resolvable:$true] %s26_s12 }
   0x4   :  { %s440_s15 = scalar_lea.hbm %s569_s0, 224 }
   0x5   :  { %p441_p0 = scmp.ne.s32.totalorder %s569_s0, %s440_s15  ;;  %p444_p1 = scmp.lt.u32.totalorder %s440_s15, %s569_s0 }
   0x7   :  { %p446_p2 = pnand %p444_p1, %p441_p0 }
   0x9   :  { %449 = shalt.err (!%p446_p2)
}
   0xa   :  { %s450_s20 = scalar_lea.vmem %s17_s10, 224  ;;  %p455_p4 = scmp.lt.s32.totalorder %s17_s10, %s17_s10 }
   0xb   :  { %p451_p3 = scmp.ne.s32.totalorder %s17_s10, %s450_s20  ;;  %p456_p5 = scmp.lt.s32.totalorder %s450_s20, %s450_s20 }
   0xd   :  { %p457_p6 = por %p456_p5, %p455_p4 }
   0xf   :  { %p458_p7 = pnand %p457_p6, %p451_p3 }
  0x11   :  { %461 = shalt.err (!%p458_p7)
}
  0x12   :  { %19 = dma.hbm_to_vmem [thread:$0]  %s569_s0, 224, %s17_s10, [#allocation3]  }
  0x13   :  { %s462_s25 = scalar_lea.hbm %s570_s1, 112 }
  0x14   :  { %p463_p8 = scmp.ne.s32.totalorder %s570_s1, %s462_s25  ;;  %p466_p9 = scmp.lt.u32.totalorder %s462_s25, %s570_s1 }
  0x16   :  { %p468_p10 = pnand %p466_p9, %p463_p8 }
  0x18   :  { %471 = shalt.err (!%p468_p10)
}
  0x19   :  { %s472_s30 = scalar_lea.vmem %s27_s12, 112  ;;  %s476_s3 = scalar_lea.vmem %s27_s12, 128 }
  0x1a   :  { %p473_p11 = scmp.ne.s32.totalorder %s27_s12, %s472_s30  ;;  %p477_p12 = scmp.lt.s32.totalorder %s27_s12, %s27_s12 }
  0x1b   :  { %p478_p13 = scmp.lt.s32.totalorder %s476_s3, %s472_s30 }
  0x1d   :  { %p479_p0 = por %p478_p13, %p477_p12 }
  0x1f   :  { %p480_p1 = pnand %p479_p0, %p473_p11 }
  0x21   :  { %483 = shalt.err (!%p480_p1)
}
  0x22   :  { %29 = dma.hbm_to_vmem [thread:$0]  %s570_s1, 112, %s27_s12, [#allocation6]  }
  0x23   :  { %506 = dma.done.wait [#allocation3], 224  }
  0x24   :  { %507 = vsyncadd [#allocation3], 4294967072 }
  0x25   :  { %508 = dma.done.wait [#allocation6], 112  }
  0x26   :  { %509 = vsyncadd [#allocation6], 4294967184  ;;  %v40_v0 = vlaneseq  ;;  %v514_v1 = vmov 1983009808   ;;  %v36_v8 = vld [vmem:[#allocation2] sm:$0xff]  ;;  %v515_v27 = vmov 0.0  }
  0x27   :  { %v78_v2 = vunpack.c.l.s4 %v514_v1  ;;  %v37_v9 = vld [vmem:[#allocation2 + $0x8] sm:$0x3f]  ;;  %v38_v10 = vld [vmem:[#allocation5] sm:$0x7f]  ;;  %v76_v12 = vcombine.high %v36_v8, %v36_v8  ;;  %vm115_vm0 = vcmask 130048   ;;  %vm516_vm1 = vmmov 0  }
  0x28   :  { %v41_v3 = vshrl.u32 %v40_v0, 7  ;;  %v93_v16 = vcombine.high %v37_v9, %v37_v9  ;;  %s517_s1 = smov [#allocation7]   ;;  %vm400_vm2 = vcmask 8192  }
  0x29   :  { %v79_v4 = vunpack.c.0.s8 %v78_v2  ;;  %s408_s5 = sshll.u32 %s517_s1, 4  ;;  %s409_s5 = int_to_ptr.vmem [resolvable:$true] %s408_s5 }
  0x2a   :  { %v46_v6 = vsub.s32 1, %v41_v3  ;;  %v62_v7 = vsub.s32 5, %v41_v3  ;;  %v42_v11 = vsub.s32 0, %v41_v3  ;;  %v58_v15 = vsub.s32 4, %v41_v3  ;;  %s484_s6 = scalar_lea.vmem %s409_s5, 16  ;;  %s488_s7 = scalar_lea.vmem %s409_s5, 32 }
  0x2b   :  { %v82_v5 = vsub.s32 %v79_v4, %v41_v3  ;;  %v54_v22 = vsub.s32 3, %v41_v3  ;;  %v50_v29 = vsub.s32 2, %v41_v3  ;;  %v66_v30 = vsub.s32 6, %v41_v3  ;;  %p485_p2 = scmp.ne.s32.totalorder %s409_s5, %s484_s6  ;;  %p489_p3 = scmp.lt.s32.totalorder %s409_s5, %s409_s5 }
  0x2c   :  { %v47_v17 = vrot.slane %v38_v10, %v46_v6  ;;  %v63_v18 = vrot.slane %v38_v10, %v62_v7  ;;  %v43_v23 = vrot.slane %v38_v10, %v42_v11  ;;  %v59_v25 = vrot.slane %v38_v10, %v58_v15  ;;  %p490_p4 = scmp.lt.s32.totalorder %s488_s7, %s484_s6 }
  0x2d   :  { %v83_v13 = vrot.slane %v36_v8, %v82_v5  ;;  %v100_v14 = vrot.slane %v37_v9, %v82_v5  ;;  %v90_v21 = vrot.slane %v76_v12, %v82_v5  ;;  %v107_v26 = vrot.slane %v93_v16, %v82_v5 }
  0x2e   :  { %184 = vmatprep.mubr.f32.mxu1 %v47_v17  ;;  %324 = vmatprep.mubr.f32.mxu0 %v63_v18  ;;  %v55_v28 = vrot.slane %v38_v10, %v54_v22  ;;  %v51_v31 = vrot.slane %v38_v10, %v50_v29  ;;  %v67_v32 = vrot.slane %v38_v10, %v66_v30  ;;  %p491_p5 = por %p490_p4, %p489_p3 }
  0x2f   :  { %v91_v19 = vcombine.high %v83_v13, %v83_v13  ;;  %v108_v20 = vcombine.high %v100_v14, %v100_v14  ;;  %v92_v24 = vcombine.high %v90_v21, %v90_v21 }
  0x30   :  { %p492_p6 = pnand %p491_p5, %p485_p2 }
  0x31   :  { %120 = vmatprep.subr.mxu1 %v91_v19  ;;  %260 = vmatprep.subr.mxu0 %v108_v20 }
  0x32   :  { %121 = vmatpush1.xpose.msra.mxu1 %v83_v13  ;;  %261 = vmatpush1.xpose.msra.mxu0 %v100_v14 }
  0x33   :  { %190 = vmatprep.subr.mxu1 %v92_v24  ;;  %422 = vmatprep.subr.mxu0 %v515_v27 }
  0x35   :  { %185 = vmatmul.mubr.f32.vlgmr.msra.gmra.mrb[0].mxu1 %v43_v23  ;;  %325 = vmatmul.mubr.f32.vlgmr.msra.gmra.mrb[0].mxu0 %v59_v25 }
  0x36   :  { %191 = vmatpush1.xpose.msra.mxu1 %v90_v21  ;;  %423 = vmatpush3.xpose.msk.msra.mxu0 %vm115_vm0, %v107_v26 }
  0x37   :  { %254 = vmatprep.mubr.f32.mxu1 %v55_v28  ;;  %424 = vmatprep.mubr.msk.f32.mxu0 %vm516_vm1, %v515_v27 }
  0x3d   :  { %255 = vmatmul.mubr.f32.vlgmr.msra.gmra.mrb[0].mxu1 %v51_v31  ;;  %425 = vmatmul.mubr.msk.f32.vlgmr.msra.gmra.mrb[0].mxu0 %vm115_vm0, %v67_v32 }
 0x110   :  { %v256_v33 = vpop.f32.mrb[0].mxu1  ;;  %v396_v34 = vpop.f32.mrb[0].mxu0 }
 0x111   :  { %v427_v35 = vadd.f32 %v396_v34, %v256_v33  ;;  %v258_v36 = vpop.f32.mrb[1].mxu1  ;;  %v426_v37 = vpop.f32.mrb[1].mxu0 }
 0x113   :  { %401 = vst.msk [vmem:[#allocation7] sm:$0x1] %vm400_vm2, %v427_v35 }
 0x114   :  { %495 = shalt.err (!%p492_p6)
}
 0x115   :  { %s496_s10 = scalar_lea.hbm %s571_s2, 16 }
 0x116   :  { %p497_p7 = scmp.ne.s32.totalorder %s571_s2, %s496_s10  ;;  %p500_p8 = scmp.lt.u32.totalorder %s496_s10, %s571_s2 }
 0x118   :  { %p502_p9 = pnand %p500_p8, %p497_p7 }
 0x11a   :  { %505 = shalt.err (!%p502_p9)
}
 0x11b   :  { %411 = dma.vmem_to_hbm [thread:$0]  %s409_s5, 16, %s571_s2, [#allocation4]  }
 0x11c   :  { %510 = dma.done.wait [#allocation4], 16  }
 0x11d   :  { %511 = vsyncadd [#allocation4], 4294967280 }
 0x11e   :  { %415 = vsyncpa [#allocation3], 1 }
 0x11f   :  { %416 = vsyncpa [#allocation6], 1 }
 0x120   :  { %417 = vsyncpa [#allocation4], 1 }

</bundles_post_ra>
